<compile_context>
chip_gen: v7x
topology: tpu7x:2x2x1
jax: 0.10.0
libtpu: 0.0.40
codegen_flags: <defaults>
</compile_context>

<pallas_src>
import math

import numpy as np
import jax
import jax.numpy as jnp
from jax.experimental import pallas as pl
from jax.experimental.pallas import tpu as pltpu

H = 16
W = 16
HW = H * W
WIN = 11               # SSIM gaussian window
SIGMA = 1.5
PAD_SSIM = WIN // 2
POOL = 31              # StructureLoss avg_pool2d kernel size
PAD_POOL = POOL // 2
N_STATS = 9
STATS_PAD = 16         # per-plane stats, padded (last dim of the output)
SUB_BLK = 64           # max planes (sublanes) per grid block; keeps vreg live-set small

# avg_pool(31, stride=1, pad=15) covers the full plane from every output pixel only
# when H, W <= PAD_POOL + 1; the algebraic collapse below relies on this.
assert H <= PAD_POOL + 1 and W <= PAD_POOL + 1
# TODO(synk): for H/W > 16 a real pooled map (separable 31-tap conv) would be needed.

LOSS_WEIGHTS = {"bce": 30.0, "iou": 0.5, "ssim": 10.0, "structure": 5.0}


def _round_up(v, m):
    return (v + m - 1) // m * m


def _gauss_band(n):
    """(n, n) band matrix A with A[o, i] = gauss11[i - o + 5]: zero-padded 'same' conv."""
    g = np.array([math.exp(-((t - WIN // 2) ** 2) / (2.0 * SIGMA ** 2)) for t in range(WIN)],
                 dtype=np.float64)
    g /= g.sum()
    a = np.zeros((n, n), np.float64)
    for o in range(n):
        for i in range(n):
            d = i - o + PAD_SSIM
            if 0 <= d < WIN:
                a[o, i] = g[d]
    return a


def _kron_gauss():
    """(HW, HW) constant K such that img_flat @ K == depthwise 11x11 gaussian blur."""
    k_conv = np.kron(_gauss_band(H), _gauss_band(W))    # blur_flat = k_conv @ img_flat
    return jnp.asarray(k_conv.T, dtype=jnp.float32)


def pix_loss_kernel(k2d_ref, pred_ref, gt_ref, out_ref):
    x = pred_ref[...]            # (P_BLK, HW) logits, one plane per row
    g = gt_ref[...]              # (P_BLK, HW) targets in [0, 1]

    def row_sum(v):              # per-plane sum: (P, HW) -> (P, 1)
        return jnp.sum(v, axis=-1, keepdims=True)

    # Shared softplus pieces: sp = log(1 + exp(-|x|)).
    # (log1p would be ~1e-7 more accurate; log(1+y) kept for guaranteed lowering.)
    sp = jnp.log(1.0 + jnp.exp(-jnp.abs(x)))
    relu_x = jnp.maximum(x, 0.0)
    relu_nx = jnp.maximum(-x, 0.0)
    log_p = jnp.maximum(-(sp + relu_nx), -100.0)    # log(sigmoid(x)), torch BCE clamp
    log_1p = jnp.maximum(-(sp + relu_x), -100.0)    # log(1 - sigmoid(x))
    p = jnp.exp(-(sp + relu_nx))                    # sigmoid(x)

    # ---------- BCE on sigmoid(pred) ----------
    bce_sum = row_sum(-(g * log_p + (1.0 - g) * log_1p))

    # ---------- IoU partial sums ----------
    iand = row_sum(p * g)
    psum = row_sum(p)
    gsum = row_sum(g)

    # ---------- StructureLoss ----------
    # avg_pool2d(gt, 31, stride=1, pad=15, count_include_pad=True) == sum(gt)/961
    # everywhere, because every pooling window covers the whole 16x16 plane.
    avg = gsum * jnp.float32(1.0 / (POOL * POOL))   # (P, 1), lane-broadcast below
    weit = 1.0 + 5.0 * jnp.abs(avg - g)
    wbce = relu_x - x * g + sp                      # BCE-with-logits, stable form
    wwbce_sum = row_sum(weit * wbce)
    weit_sum = row_sum(weit)
    inter = row_sum(p * g * weit)
    union = row_sum((p + g) * weit)

    # ---------- SSIM (depthwise 11x11 gaussian blur == one MXU matmul per map) ----
    # k2d is the kron'd gaussian, resident in VMEM (constant block index); all five
    # dots share it as the MXU RHS, so no 5-map concat / scratch copy is needed.
    k2d = k2d_ref[...]
    blur = lambda m: jnp.dot(m, k2d, preferred_element_type=jnp.float32)
    mu1 = blur(p)
    mu2 = blur(g)
    e11 = blur(p * p)
    e22 = blur(g * g)
    e12 = blur(p * g)
    mu1_sq, mu2_sq, mu12 = mu1 * mu1, mu2 * mu2, mu1 * mu2
    sigma1_sq = e11 - mu1_sq
    sigma2_sq = e22 - mu2_sq
    sigma12 = e12 - mu12
    C1, C2 = 0.01 ** 2, 0.03 ** 2
    num = (2.0 * mu12 + C1) * (2.0 * sigma12 + C2)
    den = (mu1_sq + mu2_sq + C1) * (sigma1_sq + sigma2_sq + C2)   # >= C1*C2 > 0
    ssim_sum = row_sum(num * pl.reciprocal(den, approx=True))

    # ---------- pack per-plane stats: row = plane, lane s = stat s ----------
    n_rows = x.shape[0]
    lane = jax.lax.broadcasted_iota(jnp.int32, (n_rows, STATS_PAD), 1)
    stats = jnp.zeros((n_rows, STATS_PAD), jnp.float32)
    for s, v in enumerate([ssim_sum, bce_sum, iand, psum, gsum,
                           wwbce_sum, weit_sum, inter, union]):
        stats = jnp.where(lane == s, v, stats)
    out_ref[...] = stats


def _plane_stats(preds_2d, gts_2d, n_pred, n_blk, p_blk):
    k2d = _kron_gauss()
    return pl.pallas_call(
        pix_loss_kernel,
        out_shape=jax.ShapeDtypeStruct((n_pred * n_blk * p_blk, STATS_PAD), jnp.float32),
        grid_spec=pltpu.PrefetchScalarGridSpec(
            num_scalar_prefetch=0,
            grid=(n_blk, n_pred),                    # pred innermost => gt block reused
            in_specs=[
                pl.BlockSpec((HW, HW), lambda i, k: (0, 0)),                  # K2d, resident
                pl.BlockSpec((p_blk, HW), lambda i, k: (k * n_blk + i, 0)),   # pred planes
                pl.BlockSpec((p_blk, HW), lambda i, k: (i, 0)),               # gt, no re-DMA over k
            ],
            out_specs=pl.BlockSpec((p_blk, STATS_PAD), lambda i, k: (k * n_blk + i, 0))),
        compiler_params=pltpu.CompilerParams(
            dimension_semantics=("parallel", "parallel")),    # lets v7x use both cores
    )(k2d, preds_2d, gts_2d)


def birefnet_pix_loss(scaled_preds, gt):
    """Forward of BiRefNetPixLoss: sum over preds of weighted bce/iou/ssim/structure."""
    B, C, Hh, Ww = gt.shape
    assert (Hh, Ww) == (H, W)
    n_pred = len(scaled_preds)
    for pred in scaled_preds:
        # TODO(synk): bilinear (align_corners=True) resize for preds whose shape differs
        # from gt; here all preds are assumed gt-shaped so interpolate is a no-op.
        assert pred.shape == gt.shape

    bc = B * C
    n_el = bc * HW
    p_blk = min(SUB_BLK, _round_up(bc, 8))
    bc_pad = _round_up(bc, p_blk)
    n_blk = bc_pad // p_blk

    # Free reshapes only (no host-side transpose / lane padding).
    preds = jnp.stack([p.astype(jnp.float32) for p in scaled_preds], 0).reshape(n_pred, bc, HW)
    gts = gt.astype(jnp.float32).reshape(bc, HW)
    if bc_pad != bc:
        preds = jnp.pad(preds, ((0, 0), (0, bc_pad - bc), (0, 0)))
        gts = jnp.pad(gts, ((0, bc_pad - bc), (0, 0)))
    preds = preds.reshape(n_pred * bc_pad, HW)

    stats = _plane_stats(preds, gts, n_pred, n_blk, p_blk)        # (n_pred*bc_pad, 16)
    s = stats.reshape(n_pred, bc_pad, STATS_PAD)[:, :bc].reshape(n_pred, B, C, STATS_PAD)

    ssim_mean = jnp.sum(s[..., 0], axis=(1, 2)) / n_el                    # (n_pred,)
    ssim_loss = jnp.sum(1.0 - ssim_mean) * LOSS_WEIGHTS["ssim"]

    bce_loss = jnp.sum(s[..., 1]) / n_el * LOSS_WEIGHTS["bce"]

    iand = jnp.sum(s[..., 2], axis=2)                                     # (n_pred, B)
    psum = jnp.sum(s[..., 3], axis=2)
    gsum = jnp.sum(s[..., 4], axis=2)
    # Reference IoULoss sums (1 - IoU_i) over the batch (no division by B).
    iou_loss = jnp.sum(1.0 - iand / (gsum + psum - iand)) * LOSS_WEIGHTS["iou"]

    wbce = s[..., 5] / s[..., 6]                                          # (n_pred, B, C)
    wiou = 1.0 - (s[..., 7] + 1.0) / (s[..., 8] - s[..., 7] + 1.0)
    structure_loss = jnp.sum(jnp.mean(wbce + wiou, axis=(1, 2))) * LOSS_WEIGHTS["structure"]

    return bce_loss + iou_loss + ssim_loss + structure_loss


if __name__ == "__main__":
    key = jax.random.PRNGKey(0)
    k1, k2, k3 = jax.random.split(key, 3)
    B, C = 2, 1
    pred1 = jax.random.normal(k1, (B, C, H, W), jnp.float32)   # logits
    pred2 = jax.random.normal(k2, (B, C, H, W), jnp.float32)   # logits
    gt = (jax.random.uniform(k3, (B, C, H, W)) > 0.5).astype(jnp.float32)

    loss = jax.jit(birefnet_pix_loss)([pred1, pred2], gt)
    loss = jax.block_until_ready(loss)
    assert bool(jnp.isfinite(loss))
    print("KERNEL_OK")
</pallas_src>

<mosaic_0001>
module attributes {stable_mosaic.version = 11 : i64} {
  func.func @pix_loss_kernel(%arg0: i32, %arg1: i32, %arg2: memref<256x256xf32, #tpu.memory_space<vmem>>, %arg3: memref<8x256xf32, #tpu.memory_space<vmem>>, %arg4: memref<8x256xf32, #tpu.memory_space<vmem>>, %arg5: memref<8x16xf32, #tpu.memory_space<vmem>>) attributes {dimension_semantics = [#tpu.dimension_semantics<parallel>, #tpu.dimension_semantics<parallel>], iteration_bounds = array<i64: 1, 2>, scalar_prefetch = 0 : i64, scratch_operands = 0 : i64, tpu.core_type = #tpu.core_type<tc>, window_params = [{pipeline_mode = #tpu.pipeline_mode<synchronous>, transform_indices = @transform_0, window_bounds = array<i64: 256, 256>}, {transform_indices = @transform_1, window_bounds = array<i64: 8, 256>}, {transform_indices = @transform_2, window_bounds = array<i64: 8, 256>}, {transform_indices = @transform_3, window_bounds = array<i64: 8, 16>}]} {
    %c0 = arith.constant 0 : index
    %c0_0 = arith.constant 0 : index
    %0 = vector.load %arg3[%c0, %c0_0] : memref<8x256xf32, #tpu.memory_space<vmem>>, vector<8x256xf32>
    %c0_1 = arith.constant 0 : index
    %c0_2 = arith.constant 0 : index
    %1 = vector.load %arg4[%c0_1, %c0_2] : memref<8x256xf32, #tpu.memory_space<vmem>>, vector<8x256xf32>
    %2 = math.absf %0 : vector<8x256xf32>
    %cst = arith.constant 0.000000e+00 : f32
    %3 = vector.broadcast %cst : f32 to vector<8x256xf32>
    %4 = arith.subf %3, %2 : vector<8x256xf32>
    %5 = math.exp %4 : vector<8x256xf32>
    %cst_3 = arith.constant 1.000000e+00 : f32
    %6 = vector.broadcast %cst_3 : f32 to vector<8x256xf32>
    %7 = arith.addf %6, %5 : vector<8x256xf32>
    %8 = math.log %7 : vector<8x256xf32>
    %cst_4 = arith.constant 0.000000e+00 : f32
    %9 = vector.broadcast %cst_4 : f32 to vector<8x256xf32>
    %10 = arith.maximumf %0, %9 : vector<8x256xf32>
    %cst_5 = arith.constant 0.000000e+00 : f32
    %11 = vector.broadcast %cst_5 : f32 to vector<8x256xf32>
    %12 = arith.subf %11, %0 : vector<8x256xf32>
    %cst_6 = arith.constant 0.000000e+00 : f32
    %13 = vector.broadcast %cst_6 : f32 to vector<8x256xf32>
    %14 = arith.maximumf %12, %13 : vector<8x256xf32>
    %15 = arith.addf %8, %14 : vector<8x256xf32>
    %cst_7 = arith.constant 0.000000e+00 : f32
    %16 = vector.broadcast %cst_7 : f32 to vector<8x256xf32>
    %17 = arith.subf %16, %15 : vector<8x256xf32>
    %cst_8 = arith.constant -1.000000e+02 : f32
    %18 = vector.broadcast %cst_8 : f32 to vector<8x256xf32>
    %19 = arith.maximumf %17, %18 : vector<8x256xf32>
    %20 = arith.addf %8, %10 : vector<8x256xf32>
    %cst_9 = arith.constant 0.000000e+00 : f32
    %21 = vector.broadcast %cst_9 : f32 to vector<8x256xf32>
    %22 = arith.subf %21, %20 : vector<8x256xf32>
    %cst_10 = arith.constant -1.000000e+02 : f32
    %23 = vector.broadcast %cst_10 : f32 to vector<8x256xf32>
    %24 = arith.maximumf %22, %23 : vector<8x256xf32>
    %25 = arith.addf %8, %14 : vector<8x256xf32>
    %cst_11 = arith.constant 0.000000e+00 : f32
    %26 = vector.broadcast %cst_11 : f32 to vector<8x256xf32>
    %27 = arith.subf %26, %25 : vector<8x256xf32>
    %28 = math.exp %27 : vector<8x256xf32>
    %29 = arith.mulf %1, %19 : vector<8x256xf32>
    %cst_12 = arith.constant 1.000000e+00 : f32
    %30 = vector.broadcast %cst_12 : f32 to vector<8x256xf32>
    %31 = arith.subf %30, %1 : vector<8x256xf32>
    %32 = arith.mulf %31, %24 : vector<8x256xf32>
    %33 = arith.addf %29, %32 : vector<8x256xf32>
    %cst_13 = arith.constant 0.000000e+00 : f32
    %34 = vector.broadcast %cst_13 : f32 to vector<8x256xf32>
    %35 = arith.subf %34, %33 : vector<8x256xf32>
    %cst_14 = arith.constant dense<0.000000e+00> : vector<8xf32>
    %36 = vector.multi_reduction <add>, %35, %cst_14 [1] : vector<8x256xf32> to vector<8xf32>
    %37 = vector.shape_cast %36 : vector<8xf32> to vector<8x1xf32>
    %38 = arith.mulf %28, %1 : vector<8x256xf32>
    %cst_15 = arith.constant dense<0.000000e+00> : vector<8xf32>
    %39 = vector.multi_reduction <add>, %38, %cst_15 [1] : vector<8x256xf32> to vector<8xf32>
    %40 = vector.shape_cast %39 : vector<8xf32> to vector<8x1xf32>
    %cst_16 = arith.constant dense<0.000000e+00> : vector<8xf32>
    %41 = vector.multi_reduction <add>, %28, %cst_16 [1] : vector<8x256xf32> to vector<8xf32>
    %42 = vector.shape_cast %41 : vector<8xf32> to vector<8x1xf32>
    %cst_17 = arith.constant dense<0.000000e+00> : vector<8xf32>
    %43 = vector.multi_reduction <add>, %1, %cst_17 [1] : vector<8x256xf32> to vector<8xf32>
    %44 = vector.shape_cast %43 : vector<8xf32> to vector<8x1xf32>
    %cst_18 = arith.constant 0.00104058278 : f32
    %45 = vector.broadcast %cst_18 : f32 to vector<8x1xf32>
    %46 = arith.mulf %44, %45 : vector<8x1xf32>
    %47 = vector.broadcast %46 : vector<8x1xf32> to vector<8x256xf32>
    %48 = arith.subf %47, %1 : vector<8x256xf32>
    %49 = math.absf %48 : vector<8x256xf32>
    %cst_19 = arith.constant 5.000000e+00 : f32
    %50 = vector.broadcast %cst_19 : f32 to vector<8x256xf32>
    %51 = arith.mulf %50, %49 : vector<8x256xf32>
    %cst_20 = arith.constant 1.000000e+00 : f32
    %52 = vector.broadcast %cst_20 : f32 to vector<8x256xf32>
    %53 = arith.addf %52, %51 : vector<8x256xf32>
    %54 = arith.mulf %0, %1 : vector<8x256xf32>
    %55 = arith.subf %10, %54 : vector<8x256xf32>
    %56 = arith.addf %55, %8 : vector<8x256xf32>
    %57 = arith.mulf %53, %56 : vector<8x256xf32>
    %cst_21 = arith.constant dense<0.000000e+00> : vector<8xf32>
    %58 = vector.multi_reduction <add>, %57, %cst_21 [1] : vector<8x256xf32> to vector<8xf32>
    %59 = vector.shape_cast %58 : vector<8xf32> to vector<8x1xf32>
    %cst_22 = arith.constant dense<0.000000e+00> : vector<8xf32>
    %60 = vector.multi_reduction <add>, %53, %cst_22 [1] : vector<8x256xf32> to vector<8xf32>
    %61 = vector.shape_cast %60 : vector<8xf32> to vector<8x1xf32>
    %62 = arith.mulf %28, %1 : vector<8x256xf32>
    %63 = arith.mulf %62, %53 : vector<8x256xf32>
    %cst_23 = arith.constant dense<0.000000e+00> : vector<8xf32>
    %64 = vector.multi_reduction <add>, %63, %cst_23 [1] : vector<8x256xf32> to vector<8xf32>
    %65 = vector.shape_cast %64 : vector<8xf32> to vector<8x1xf32>
    %66 = arith.addf %28, %1 : vector<8x256xf32>
    %67 = arith.mulf %66, %53 : vector<8x256xf32>
    %cst_24 = arith.constant dense<0.000000e+00> : vector<8xf32>
    %68 = vector.multi_reduction <add>, %67, %cst_24 [1] : vector<8x256xf32> to vector<8xf32>
    %69 = vector.shape_cast %68 : vector<8xf32> to vector<8x1xf32>
    %c0_25 = arith.constant 0 : index
    %c0_26 = arith.constant 0 : index
    %70 = vector.load %arg2[%c0_25, %c0_26] : memref<256x256xf32, #tpu.memory_space<vmem>>, vector<256x256xf32>
    %cst_27 = arith.constant dense<0.000000e+00> : vector<8x256xf32>
    %71 = tpu.matmul %28, %70, %cst_27 {dimension_numbers = #tpu.dot_dimension_numbers<[1], [0], [0], [1], [0, 0, 1, 1], [], []>} : vector<8x256xf32>, vector<256x256xf32>, vector<8x256xf32> -> vector<8x256xf32>
    %cst_28 = arith.constant dense<0.000000e+00> : vector<8x256xf32>
    %72 = tpu.matmul %1, %70, %cst_28 {dimension_numbers = #tpu.dot_dimension_numbers<[1], [0], [0], [1], [0, 0, 1, 1], [], []>} : vector<8x256xf32>, vector<256x256xf32>, vector<8x256xf32> -> vector<8x256xf32>
    %73 = arith.mulf %28, %28 : vector<8x256xf32>
    %cst_29 = arith.constant dense<0.000000e+00> : vector<8x256xf32>
    %74 = tpu.matmul %73, %70, %cst_29 {dimension_numbers = #tpu.dot_dimension_numbers<[1], [0], [0], [1], [0, 0, 1, 1], [], []>} : vector<8x256xf32>, vector<256x256xf32>, vector<8x256xf32> -> vector<8x256xf32>
    %75 = arith.mulf %1, %1 : vector<8x256xf32>
    %cst_30 = arith.constant dense<0.000000e+00> : vector<8x256xf32>
    %76 = tpu.matmul %75, %70, %cst_30 {dimension_numbers = #tpu.dot_dimension_numbers<[1], [0], [0], [1], [0, 0, 1, 1], [], []>} : vector<8x256xf32>, vector<256x256xf32>, vector<8x256xf32> -> vector<8x256xf32>
    %77 = arith.mulf %28, %1 : vector<8x256xf32>
    %cst_31 = arith.constant dense<0.000000e+00> : vector<8x256xf32>
    %78 = tpu.matmul %77, %70, %cst_31 {dimension_numbers = #tpu.dot_dimension_numbers<[1], [0], [0], [1], [0, 0, 1, 1], [], []>} : vector<8x256xf32>, vector<256x256xf32>, vector<8x256xf32> -> vector<8x256xf32>
    %79 = arith.mulf %71, %71 : vector<8x256xf32>
    %80 = arith.mulf %72, %72 : vector<8x256xf32>
    %81 = arith.mulf %71, %72 : vector<8x256xf32>
    %82 = arith.subf %74, %79 : vector<8x256xf32>
    %83 = arith.subf %76, %80 : vector<8x256xf32>
    %84 = arith.subf %78, %81 : vector<8x256xf32>
    %cst_32 = arith.constant 2.000000e+00 : f32
    %85 = vector.broadcast %cst_32 : f32 to vector<8x256xf32>
    %86 = arith.mulf %85, %81 : vector<8x256xf32>
    %cst_33 = arith.constant 9.99999974E-5 : f32
    %87 = vector.broadcast %cst_33 : f32 to vector<8x256xf32>
    %88 = arith.addf %86, %87 : vector<8x256xf32>
    %cst_34 = arith.constant 2.000000e+00 : f32
    %89 = vector.broadcast %cst_34 : f32 to vector<8x256xf32>
    %90 = arith.mulf %89, %84 : vector<8x256xf32>
    %cst_35 = arith.constant 8.99999984E-4 : f32
    %91 = vector.broadcast %cst_35 : f32 to vector<8x256xf32>
    %92 = arith.addf %90, %91 : vector<8x256xf32>
    %93 = arith.mulf %88, %92 : vector<8x256xf32>
    %94 = arith.addf %79, %80 : vector<8x256xf32>
    %cst_36 = arith.constant 9.99999974E-5 : f32
    %95 = vector.broadcast %cst_36 : f32 to vector<8x256xf32>
    %96 = arith.addf %94, %95 : vector<8x256xf32>
    %97 = arith.addf %82, %83 : vector<8x256xf32>
    %cst_37 = arith.constant 8.99999984E-4 : f32
    %98 = vector.broadcast %cst_37 : f32 to vector<8x256xf32>
    %99 = arith.addf %97, %98 : vector<8x256xf32>
    %100 = arith.mulf %96, %99 : vector<8x256xf32>
    %101 = tpu.reciprocal %100 {approx = true} : vector<8x256xf32> -> vector<8x256xf32>
    %102 = arith.mulf %93, %101 : vector<8x256xf32>
    %cst_38 = arith.constant dense<0.000000e+00> : vector<8xf32>
    %103 = vector.multi_reduction <add>, %102, %cst_38 [1] : vector<8x256xf32> to vector<8xf32>
    %104 = vector.shape_cast %103 : vector<8xf32> to vector<8x1xf32>
    %105 = tpu.iota {dimensions = array<i32: 1>} : vector<8x16xi32>
    %cst_39 = arith.constant 0.000000e+00 : f32
    %106 = vector.broadcast %cst_39 : f32 to vector<8x16xf32>
    %c0_i32 = arith.constant 0 : i32
    %107 = vector.broadcast %c0_i32 : i32 to vector<8x16xi32>
    %108 = arith.cmpi eq, %105, %107 : vector<8x16xi32>
    %109 = vector.shape_cast %104 : vector<8x1xf32> to vector<8x1xf32>
    %110 = vector.broadcast %109 : vector<8x1xf32> to vector<8x16xf32>
    %111 = arith.select %108, %110, %106 : vector<8x16xi1>, vector<8x16xf32>
    %c1_i32 = arith.constant 1 : i32
    %112 = vector.broadcast %c1_i32 : i32 to vector<8x16xi32>
    %113 = arith.cmpi eq, %105, %112 : vector<8x16xi32>
    %114 = vector.shape_cast %37 : vector<8x1xf32> to vector<8x1xf32>
    %115 = vector.broadcast %114 : vector<8x1xf32> to vector<8x16xf32>
    %116 = arith.select %113, %115, %111 : vector<8x16xi1>, vector<8x16xf32>
    %c2_i32 = arith.constant 2 : i32
    %117 = vector.broadcast %c2_i32 : i32 to vector<8x16xi32>
    %118 = arith.cmpi eq, %105, %117 : vector<8x16xi32>
    %119 = vector.shape_cast %40 : vector<8x1xf32> to vector<8x1xf32>
    %120 = vector.broadcast %119 : vector<8x1xf32> to vector<8x16xf32>
    %121 = arith.select %118, %120, %116 : vector<8x16xi1>, vector<8x16xf32>
    %c3_i32 = arith.constant 3 : i32
    %122 = vector.broadcast %c3_i32 : i32 to vector<8x16xi32>
    %123 = arith.cmpi eq, %105, %122 : vector<8x16xi32>
    %124 = vector.shape_cast %42 : vector<8x1xf32> to vector<8x1xf32>
    %125 = vector.broadcast %124 : vector<8x1xf32> to vector<8x16xf32>
    %126 = arith.select %123, %125, %121 : vector<8x16xi1>, vector<8x16xf32>
    %c4_i32 = arith.constant 4 : i32
    %127 = vector.broadcast %c4_i32 : i32 to vector<8x16xi32>
    %128 = arith.cmpi eq, %105, %127 : vector<8x16xi32>
    %129 = vector.shape_cast %44 : vector<8x1xf32> to vector<8x1xf32>
    %130 = vector.broadcast %129 : vector<8x1xf32> to vector<8x16xf32>
    %131 = arith.select %128, %130, %126 : vector<8x16xi1>, vector<8x16xf32>
    %c5_i32 = arith.constant 5 : i32
    %132 = vector.broadcast %c5_i32 : i32 to vector<8x16xi32>
    %133 = arith.cmpi eq, %105, %132 : vector<8x16xi32>
    %134 = vector.shape_cast %59 : vector<8x1xf32> to vector<8x1xf32>
    %135 = vector.broadcast %134 : vector<8x1xf32> to vector<8x16xf32>
    %136 = arith.select %133, %135, %131 : vector<8x16xi1>, vector<8x16xf32>
    %c6_i32 = arith.constant 6 : i32
    %137 = vector.broadcast %c6_i32 : i32 to vector<8x16xi32>
    %138 = arith.cmpi eq, %105, %137 : vector<8x16xi32>
    %139 = vector.shape_cast %61 : vector<8x1xf32> to vector<8x1xf32>
    %140 = vector.broadcast %139 : vector<8x1xf32> to vector<8x16xf32>
    %141 = arith.select %138, %140, %136 : vector<8x16xi1>, vector<8x16xf32>
    %c7_i32 = arith.constant 7 : i32
    %142 = vector.broadcast %c7_i32 : i32 to vector<8x16xi32>
    %143 = arith.cmpi eq, %105, %142 : vector<8x16xi32>
    %144 = vector.shape_cast %65 : vector<8x1xf32> to vector<8x1xf32>
    %145 = vector.broadcast %144 : vector<8x1xf32> to vector<8x16xf32>
    %146 = arith.select %143, %145, %141 : vector<8x16xi1>, vector<8x16xf32>
    %c8_i32 = arith.constant 8 : i32
    %147 = vector.broadcast %c8_i32 : i32 to vector<8x16xi32>
    %148 = arith.cmpi eq, %105, %147 : vector<8x16xi32>
    %149 = vector.shape_cast %69 : vector<8x1xf32> to vector<8x1xf32>
    %150 = vector.broadcast %149 : vector<8x1xf32> to vector<8x16xf32>
    %151 = arith.select %148, %150, %146 : vector<8x16xi1>, vector<8x16xf32>
    %c0_40 = arith.constant 0 : index
    %c0_41 = arith.constant 0 : index
    %152 = vector.load %arg5[%c0_40, %c0_41] : memref<8x16xf32, #tpu.memory_space<vmem>>, vector<8x16xf32>
    tpu.vector_store %arg5[%c0_40, %c0_41], %151 {strides = array<i32>} : memref<8x16xf32, #tpu.memory_space<vmem>>, vector<8x16xf32>,
    return
  }
  func.func @transform_0(%arg0: i32, %arg1: i32) -> (i32, i32) {
    %c0_i32 = arith.constant 0 : i32
    %c0_i32_0 = arith.constant 0 : i32
    %c0_i32_1 = arith.constant 0 : i32
    return %c0_i32, %c0_i32_0 : i32, i32
  }
  func.func @transform_1(%arg0: i32, %arg1: i32) -> (i32, i32) {
    %c1_i32 = arith.constant 1 : i32
    %0 = arith.muli %arg1, %c1_i32 : i32
    %1 = arith.addi %0, %arg0 : i32
    %c0_i32 = arith.constant 0 : i32
    %c0_i32_0 = arith.constant 0 : i32
    return %1, %c0_i32 : i32, i32
  }
  func.func @transform_2(%arg0: i32, %arg1: i32) -> (i32, i32) {
    %c0_i32 = arith.constant 0 : i32
    %c0_i32_0 = arith.constant 0 : i32
    return %arg0, %c0_i32 : i32, i32
  }
  func.func @transform_3(%arg0: i32, %arg1: i32) -> (i32, i32) {
    %c1_i32 = arith.constant 1 : i32
    %0 = arith.muli %arg1, %c1_i32 : i32
    %1 = arith.addi %0, %arg0 : i32
    %c0_i32 = arith.constant 0 : i32
    %c0_i32_0 = arith.constant 0 : i32
    return %1, %c0_i32 : i32, i32
  }
}

</mosaic_0001>

<bundles_post_ra>
// kernel: birefnet_pix_loss.1
= control target key start
LH: loop header
LB: loop body
LE: loop exit
PB: predicated region body
PF: predicated region fallthrough
CT: control target
= control target key end

     0   :  { %8 = vsyncpa [#allocation3], 0  ;;  %s1369_s12 = smov 0   ;;  %s1371_s13 = smov 0   ;;  %s1764_s0 = inlined_call_operand.hbm [shape: f32[256,256], index: 0, kind: input, shape index: {}]   ;;  %s1765_s1 = inlined_call_operand.vmem [shape: f32[16,256], index: 1, kind: input, shape index: {}]   ;;  %s1766_s2 = inlined_call_operand.vmem [shape: f32[8,256], index: 2, kind: input, shape index: {}]   ;;  %s1767_s3 = inlined_call_operand.vmem [shape: f32[16,16], index: 3, kind: output, shape index: {}]  }
   0x1   :  { %s1373_s14 = smov 0  }
   0x2 LB: > { %s903_s15 = sadd.s32 4294967295, %s1344_s14   ;;  %s23_s16 = sadd.s32 1, %s1340_s13  ;;  %s1344_s14 = sphi %s1373_s14, %s14_s14   ;;  %s1340_s13 = sphi %s1371_s13, %s1777_s13   ;;  %s1336_s12 = sphi %s1369_s12, %s1776_s12  }
   0x3   : > { %p24_p0 = scmp.ge.s32.totalorder %s23_s16, 2  ;;  %p905_p1 = scmp.ge.s32.totalorder %s1344_s14, 1 }
   0x4   : > { %p134_p2 = scmp.lt.s32.totalorder %s1344_s14, 3  ;;  %p1394_p4 = scmp.eq.s32.totalorder %s903_s15, 0 }
   0x5   : > { %s1779_s16 = smov (%p24_p0, %s23_s16), 0  ;;  %s1346_s19 = smov [#allocation2]  }
   0x6   : > { %p1390_p3 = pnand %p905_p1, %p134_p2  ;;  %s146_s20 = sshll.u32 %s1346_s19, 4  ;;  %s147_s20 = int_to_ptr.vmem [resolvable:$true] %s146_s20 }
   0x7   : > { %s1772_s18 = scalar_select %p1394_p4, 1, 0 }
   0x8   : > { %s1771_s17 = scalar_select %p1390_p3, 1, 0 }
   0x9   : > { %p1241_p5 = pneg %p1390_p3  ;;  %s1290_s24 = scalar_lea.hbm %s1764_s0, 8192 }
   0xa   : > { %p1291_p7 = scmp.ne.s32.totalorder %s1764_s0, %s1290_s24  ;;  %p1297_p11 = scmp.lt.u32.totalorder %s1290_s24, %s1764_s0 }
   0xb   : > { %p1402_p6 = pnand %p1394_p4, %p1241_p5 }
   0xd   : > { %p1292_p8 = pneg %p1402_p6 }
   0xf   : > { %p1293_p9 = pnand %p1292_p8, %p1291_p7 }
  0x11   : > { %p1294_p10 = pneg %p1293_p9 }
  0x13   : > { %p1299_p12 = pnand %p1297_p11, %p1294_p10 }
  0x15   : > { %1302 = shalt.err (!%p1299_p12)
}
  0x16   : > { %s1303_s29 = scalar_lea.vmem %s147_s20, 8192  ;;  %p1311_p2 = scmp.lt.s32.totalorder %s147_s20, %s147_s20 }
  0x17   : > { %p1304_p13 = scmp.ne.s32.totalorder %s147_s20, %s1303_s29  ;;  %p1312_p5 = scmp.lt.s32.totalorder %s1303_s29, %s1303_s29 }
  0x19   : > { %p1306_p0 = pnand %p1304_p13, %p1292_p8  ;;  %p1313_p4 = por %p1312_p5, %p1311_p2 }
  0x1b   : > { %p1307_p1 = pneg %p1306_p0 }
  0x1d   : > { %p1314_p3 = pnand %p1313_p4, %p1307_p1 }
  0x1f   : > { %1317 = shalt.err (!%p1314_p3)
}
  0x20   : > { %s1347_s30 = smov 256   ;;  %s1348_s4 = smov 16  }
  0x21   : > { %1244 = dma.hbm_to_vmem [thread:$0]  (!%p1402_p6), %s1764_s0, 8192, %s147_s20, [#allocation3], %s1347_s30, %s1347_s30, %s1348_s4  }
  0x22   : > { %p1774_p7 = scmp.ne.s32.totalorder %s1771_s17, 0 }
  0x23   : > { %p1775_p9 = scmp.ne.s32.totalorder (!%p1774_p7), %s1772_s18, 0 }
  0x24   : > { %180 = sbr.rel (%p1774_p7) target bundleno = 617 (0x269), region = 32 }
  0x2b   : > { %1331 = dma.done.wait (%p1775_p9), [#allocation3], 8192  }
  0x2c   : > { %1333 = vsyncadd (%p1775_p9), [#allocation3], 4294959104  ;;  %v328_v0 = vld [vmem:[#allocation2 + $0x8] sm:$0xff]  ;;  %v330_v1 = vld [vmem:[#allocation2 + $0x18] sm:$0xff]  ;;  %p211_p3 = scmp.lt.s32.totalorder %s1336_s12, 1  ;;  %vm809_vm9 = vcmask 130048  }
  0x2d   : > { %v327_v2 = vld [vmem:[#allocation2] sm:$0xff]  ;;  %v1428_v3 = vpack.c.bf16 %v330_v1, %v328_v0  ;;  %v329_v4 = vld [vmem:[#allocation2 + $0x10] sm:$0xff]  ;;  %v332_v5 = vld [vmem:[#allocation2 + $0x28] sm:$0xff] }
  0x2e   : > { %v334_v6 = vld [vmem:[#allocation2 + $0x38] sm:$0xff]  ;;  %v1430_v7 = vpack.c.bf16 %v329_v4, %v327_v2  ;;  %v331_v9 = vld [vmem:[#allocation2 + $0x20] sm:$0xff]  ;;  %v333_v10 = vld [vmem:[#allocation2 + $0x30] sm:$0xff]  ;;  %s1781_s12 = smov (!%p211_p3, %s1336_s12), 1 }
  0x2f   : > { %v1432_v8 = vpack.c.bf16 %v334_v6, %v332_v5  ;;  %v336_v11 = vld [vmem:[#allocation2 + $0x48] sm:$0xff]  ;;  %918 = vmatprep.subr.bf16.mxu0 %v1428_v3  ;;  %982 = vmatprep.subr.bf16.mxu1 %v1428_v3  ;;  %v338_v12 = vld [vmem:[#allocation2 + $0x58] sm:$0xff]  ;;  %v1438_v13 = vpack.c.bf16 %v333_v10, %v331_v9  ;;  %v335_v15 = vld [vmem:[#allocation2 + $0x40] sm:$0xff]  ;;  %s916_s7 = sshll.u32 %s1781_s12, 4  ;;  %s913_s19 = sshll.u32 %s1781_s12, 3 }
  0x30   : > { %920 = vmatpush1.bf16.msra.mxu0 %v1430_v7  ;;  %984 = vmatpush1.bf16.msra.mxu1 %v1430_v7  ;;  %v1442_v14 = vpack.c.bf16 %v338_v12, %v336_v11  ;;  %v337_v16 = vld [vmem:[#allocation2 + $0x50] sm:$0xff]  ;;  %v340_v17 = vld [vmem:[#allocation2 + $0x68] sm:$0xff]  ;;  %v342_v18 = vld [vmem:[#allocation2 + $0x78] sm:$0xff]  ;;  %s215_s10 = scalar_lea.vmem %s1765_s1, %s916_s7  ;;  %s226_s22 = scalar_lea.vmem %s1767_s3, %s913_s19 }
  0x31   : > { %922 = vmatprep.subr.bf16.mxu0 %v1432_v8  ;;  %986 = vmatprep.subr.bf16.mxu1 %v1432_v8  ;;  %v1447_v19 = vpack.c.bf16 %v337_v16, %v335_v15  ;;  %v1451_v20 = vpack.c.bf16 %v342_v18, %v340_v17  ;;  %v339_v21 = vld [vmem:[#allocation2 + $0x60] sm:$0xff]  ;;  %v341_v22 = vld [vmem:[#allocation2 + $0x70] sm:$0xff]  ;;  %v344_v23 = vld [vmem:[#allocation2 + $0x88] sm:$0xff] }
  0x32   : > { %v346_v24 = vld [vmem:[#allocation2 + $0x98] sm:$0xff]  ;;  %v1458_v25 = vpack.c.bf16 %v341_v22, %v339_v21  ;;  %v343_v27 = vld [vmem:[#allocation2 + $0x80] sm:$0xff]  ;;  %v345_v28 = vld [vmem:[#allocation2 + $0x90] sm:$0xff] }
  0x33   : > { %v1462_v26 = vpack.c.bf16 %v346_v24, %v344_v23  ;;  %v348_v29 = vld [vmem:[#allocation2 + $0xa8] sm:$0xff]  ;;  %v350_v30 = vld [vmem:[#allocation2 + $0xb8] sm:$0xff]  ;;  %v1467_v31 = vpack.c.bf16 %v345_v28, %v343_v27  ;;  %v347_v33 = vld [vmem:[#allocation2 + $0xa0] sm:$0xff] }
  0x34   : > { %924 = vmatpush1.bf16.msra.mxu0 %v1438_v13  ;;  %988 = vmatpush1.bf16.msra.mxu1 %v1438_v13  ;;  %v1471_v32 = vpack.c.bf16 %v350_v30, %v348_v29  ;;  %v349_v34 = vld [vmem:[#allocation2 + $0xb0] sm:$0xff]  ;;  %v352_v35 = vld [vmem:[#allocation2 + $0xc8] sm:$0xff]  ;;  %v354_v36 = vld [vmem:[#allocation2 + $0xd8] sm:$0xff] }
  0x35   : > { %926 = vmatprep.subr.bf16.mxu0 %v1442_v14  ;;  %990 = vmatprep.subr.bf16.mxu1 %v1442_v14  ;;  %v1478_v37 = vpack.c.bf16 %v349_v34, %v347_v33  ;;  %v351_v38 = vld [vmem:[#allocation2 + $0xc0] sm:$0xff]  ;;  %v1482_v39 = vpack.c.bf16 %v354_v36, %v352_v35  ;;  %v353_v40 = vld [vmem:[#allocation2 + $0xd0] sm:$0xff]  ;;  %v1484_v41 = vld [vmem:[%s215_s10 + $0x8] sm:$0xff] }
  0x36   : > { %v1489_v42 = vld [vmem:[%s1766_s2 + $0x8] sm:$0xff]  ;;  %v358_v44 = vld [vmem:[#allocation2 + $0xf8] sm:$0xff]  ;;  %v233_v45 = vand.u32 2147483647, %v1484_v41  ;;  %v1493_v46 = vld [vmem:[%s215_s10] sm:$0xff]  ;;  %v1498_v48 = vpack.c.bf16 %v353_v40, %v351_v38 }
  0x37   : > { %v356_v43 = vld [vmem:[#allocation2 + $0xe8] sm:$0xff]  ;;  %526 = vmatprep.mubr.f32.mxu1 %v1489_v42  ;;  %v232_v47 = vand.u32 2147483647, %v1493_v46  ;;  %v355_v51 = vld [vmem:[#allocation2 + $0xe0] sm:$0xff]  ;;  %v357_v52 = vld [vmem:[#allocation2 + $0xf0] sm:$0xff] }
  0x38   : > { %928 = vmatpush1.bf16.msra.mxu0 %v1447_v19  ;;  %992 = vmatpush1.bf16.msra.mxu1 %v1447_v19  ;;  %v235_v49 = vsub.f32 0.0, %v233_v45  ;;  %v1502_v50 = vpack.c.bf16 %v358_v44, %v356_v43  ;;  %v360_v54 = vld [vmem:[#allocation2 + $0x108] sm:$0xff]  ;;  %v362_v55 = vld [vmem:[#allocation2 + $0x118] sm:$0xff]  ;;  %v1506_v58 = vpack.c.bf16 %v357_v52, %v355_v51  ;;  %v359_v60 = vld [vmem:[#allocation2 + $0x100] sm:$0xff]  ;;  %v249_v43 = vsub.f32 0.0, %v1484_v41 }
  0x39   : > { %930 = vmatprep.subr.bf16.mxu0 %v1451_v20  ;;  %994 = vmatprep.subr.bf16.mxu1 %v1451_v20  ;;  %v234_v53 = vsub.f32 0.0, %v232_v47  ;;  %v1510_v59 = vpack.c.bf16 %v362_v55, %v360_v54  ;;  %v361_v61 = vld [vmem:[#allocation2 + $0x110] sm:$0xff]  ;;  %v364_v62 = vld [vmem:[#allocation2 + $0x128] sm:$0xff]  ;;  %v366_v63 = vld [vmem:[#allocation2 + $0x138] sm:$0xff]  ;;  %v248_v44 = vsub.f32 0.0, %v1493_v46 }
  0x3a   : > { %v238_v56 = vmul.f32 1.442695, %v235_v49  ;;  %v1514_v0 = vpack.c.bf16 %v361_v61, %v359_v60  ;;  %v1518_v1 = vpack.c.bf16 %v366_v63, %v364_v62  ;;  %v363_v2 = vld [vmem:[#allocation2 + $0x120] sm:$0xff]  ;;  %v365_v4 = vld [vmem:[#allocation2 + $0x130] sm:$0xff]  ;;  %v368_v5 = vld [vmem:[#allocation2 + $0x148] sm:$0xff]  ;;  %v251_v54 = vmax.f32 %v249_v43, 0.0 }
  0x3b   : > { %v236_v57 = vmul.f32 1.442695, %v234_v53  ;;  %v370_v6 = vld [vmem:[#allocation2 + $0x158] sm:$0xff]  ;;  %v1522_v9 = vpack.c.bf16 %v365_v4, %v363_v2  ;;  %v367_v11 = vld [vmem:[#allocation2 + $0x140] sm:$0xff]  ;;  %v369_v12 = vld [vmem:[#allocation2 + $0x150] sm:$0xff] }
  0x3c   : > { %932 = vmatpush1.bf16.msra.mxu0 %v1458_v25  ;;  %996 = vmatpush1.bf16.msra.mxu1 %v1458_v25  ;;  %1274 = vpow2.f32 %v238_v56  ;;  %v1526_v10 = vpack.c.bf16 %v370_v6, %v368_v5  ;;  %v372_v16 = vld [vmem:[#allocation2 + $0x168] sm:$0xff]  ;;  %v374_v17 = vld [vmem:[#allocation2 + $0x178] sm:$0xff]  ;;  %v1530_v22 = vpack.c.bf16 %v369_v12, %v367_v11  ;;  %v371_v27 = vld [vmem:[#allocation2 + $0x160] sm:$0xff]  ;;  %v250_v56 = vmax.f32 %v248_v44, 0.0 }
  0x3d   : > { %934 = vmatprep.subr.bf16.mxu0 %v1462_v26  ;;  %998 = vmatprep.subr.bf16.mxu1 %v1462_v26  ;;  %1276 = vpow2.f32 %v236_v57  ;;  %v1534_v24 = vpack.c.bf16 %v374_v17, %v372_v16  ;;  %v373_v28 = vld [vmem:[#allocation2 + $0x170] sm:$0xff]  ;;  %v376_v29 = vld [vmem:[#allocation2 + $0x188] sm:$0xff]  ;;  %v378_v30 = vld [vmem:[#allocation2 + $0x198] sm:$0xff] }
  0x3e   : > { %v1538_v33 = vpack.c.bf16 %v373_v28, %v371_v27  ;;  %v1542_v34 = vpack.c.bf16 %v378_v30, %v376_v29  ;;  %v375_v35 = vld [vmem:[#allocation2 + $0x180] sm:$0xff]  ;;  %v377_v36 = vld [vmem:[#allocation2 + $0x190] sm:$0xff]  ;;  %v380_v38 = vld [vmem:[#allocation2 + $0x1a8] sm:$0xff] }
  0x3f   : > { %v382_v40 = vld [vmem:[#allocation2 + $0x1b8] sm:$0xff]  ;;  %v1548_v45 = vpack.c.bf16 %v377_v36, %v375_v35  ;;  %v379_v49 = vld [vmem:[#allocation2 + $0x1a0] sm:$0xff]  ;;  %v381_v51 = vld [vmem:[#allocation2 + $0x1b0] sm:$0xff]  ;;  %v607_v35 = vmul.f32 %v1489_v42, %v1489_v42 }
  0x40   : > { %936 = vmatpush1.bf16.msra.mxu0 %v1467_v31  ;;  %1000 = vmatpush1.bf16.msra.mxu1 %v1467_v31  ;;  %v1552_v47 = vpack.c.bf16 %v382_v40, %v380_v38  ;;  %v384_v52 = vld [vmem:[#allocation2 + $0x1c8] sm:$0xff]  ;;  %v386_v53 = vld [vmem:[#allocation2 + $0x1d8] sm:$0xff]  ;;  %v1556_v60 = vpack.c.bf16 %v381_v51, %v379_v49  ;;  %v383_v63 = vld [vmem:[#allocation2 + $0x1c0] sm:$0xff] }
  0x41   : > { %938 = vmatprep.subr.bf16.mxu0 %v1471_v32  ;;  %1002 = vmatprep.subr.bf16.mxu1 %v1471_v32  ;;  %v1562_v62 = vpack.c.bf16 %v386_v53, %v384_v52  ;;  %v385_v2 = vld [vmem:[#allocation2 + $0x1d0] sm:$0xff]  ;;  %v388_v5 = vld [vmem:[#allocation2 + $0x1e8] sm:$0xff]  ;;  %v390_v6 = vld [vmem:[#allocation2 + $0x1f8] sm:$0xff] }
  0x42   : > { %v1579_v17 = vpack.c.bf16 %v390_v6, %v388_v5  ;;  %v1597_v30 = vld [vmem:[%s1766_s2] sm:$0xff] }
  0x43   : > { %v289_v43 = vadd.f32 %v1489_v42, %v1597_v30  ;;  %v606_v44 = vmul.f32 %v1597_v30, %v1597_v30 }
  0x44   : > { %940 = vmatpush1.bf16.msra.mxu0 %v1478_v37  ;;  %1004 = vmatpush1.bf16.msra.mxu1 %v1478_v37 }
  0x45   : > { %942 = vmatprep.subr.bf16.mxu0 %v1482_v39  ;;  %1006 = vmatprep.subr.bf16.mxu1 %v1482_v39 }
  0x46   : > { %v1275_v15 = vpop.eup %1274  ;;  %290 = vadd.xlane.f32.xlu0 %v289_v43 }
  0x47   : > { %v1277_v18 = vpop.eup %1276  ;;  %v241_v21 = vadd.f32 1.0, %v1275_v15  ;;  %v1574_v15 = vpack.c.bf16 %v385_v2, %v383_v63 }
  0x48   : > { %944 = vmatpush1.bf16.msra.mxu0 %v1498_v48  ;;  %1008 = vmatpush1.bf16.msra.mxu1 %v1498_v48  ;;  %v240_v23 = vadd.f32 1.0, %v1277_v18  ;;  %v387_v18 = vld [vmem:[#allocation2 + $0x1e0] sm:$0xff] }
  0x49   : > { %946 = vmatprep.subr.bf16.mxu0 %v1502_v50  ;;  %1010 = vmatprep.subr.bf16.mxu1 %v1502_v50  ;;  %1278 = vlog2.f32 %v241_v21  ;;  %v389_v21 = vld [vmem:[#allocation2 + $0x1f0] sm:$0xff] }
  0x4a   : > { %1280 = vlog2.f32 %v240_v23  ;;  %v1588_v29 = vpack.c.bf16 %v389_v21, %v387_v18 }
  0x4c   : > { %948 = vmatpush1.bf16.msra.mxu0 %v1506_v58  ;;  %1012 = vmatpush1.bf16.msra.mxu1 %v1506_v58 }
  0x4d   : > { %950 = vmatprep.subr.bf16.mxu0 %v1510_v59  ;;  %1014 = vmatprep.subr.bf16.mxu1 %v1510_v59 }
  0x50   : > { %952 = vmatpush1.bf16.msra.mxu0 %v1514_v0  ;;  %1016 = vmatpush1.bf16.msra.mxu1 %v1514_v0 }
  0x51   : > { %954 = vmatprep.subr.bf16.mxu0 %v1518_v1  ;;  %1018 = vmatprep.subr.bf16.mxu1 %v1518_v1 }
  0x53   : > { %v1279_v55 = vpop.eup %1278 }
  0x54   : > { %956 = vmatpush1.bf16.msra.mxu0 %v1522_v9  ;;  %1020 = vmatpush1.bf16.msra.mxu1 %v1522_v9  ;;  %v1281_v57 = vpop.eup %1280  ;;  %v1558_v61 = vmul.f32 0.6931472, %v1279_v55 }
  0x55   : > { %958 = vmatprep.subr.bf16.mxu0 %v1526_v10  ;;  %1022 = vmatprep.subr.bf16.mxu1 %v1526_v10  ;;  %v1564_v4 = vmul.f32 0.6931472, %v1281_v57 }
  0x56   : > { %v1567_v11 = vadd.f32 %v251_v54, %v1558_v61 }
  0x57   : > { %v1570_v12 = vadd.f32 %v250_v56, %v1564_v4 }
  0x58   : > { %960 = vmatpush1.bf16.msra.mxu0 %v1530_v22  ;;  %1024 = vmatpush1.bf16.msra.mxu1 %v1530_v22  ;;  %v255_v16 = vsub.f32 0.0, %v1567_v11 }
  0x59   : > { %962 = vmatprep.subr.bf16.mxu0 %v1534_v24  ;;  %1026 = vmatprep.subr.bf16.mxu1 %v1534_v24  ;;  %v254_v23 = vsub.f32 0.0, %v1570_v12  ;;  %v301_v12 = vmul.f32 %v1597_v30, %v1493_v46 }
  0x5a   : > { %v266_v27 = vmul.f32 1.442695, %v255_v16 }
  0x5b   : > { %v264_v28 = vmul.f32 1.442695, %v254_v23 }
  0x5c   : > { %964 = vmatpush1.bf16.msra.mxu0 %v1538_v33  ;;  %1028 = vmatpush1.bf16.msra.mxu1 %v1538_v33  ;;  %1282 = vpow2.f32 %v266_v27 }
  0x5d   : > { %966 = vmatprep.subr.bf16.mxu0 %v1542_v34  ;;  %1030 = vmatprep.subr.bf16.mxu1 %v1542_v34  ;;  %1284 = vpow2.f32 %v264_v28 }
  0x60   : > { %968 = vmatpush1.bf16.msra.mxu0 %v1548_v45  ;;  %1032 = vmatpush1.bf16.msra.mxu1 %v1548_v45 }
  0x61   : > { %970 = vmatprep.subr.bf16.mxu0 %v1552_v47  ;;  %1034 = vmatprep.subr.bf16.mxu1 %v1552_v47 }
  0x64   : > { %972 = vmatpush1.bf16.msra.mxu0 %v1556_v60  ;;  %1036 = vmatpush1.bf16.msra.mxu1 %v1556_v60 }
  0x65   : > { %974 = vmatprep.subr.bf16.mxu0 %v1562_v62  ;;  %1038 = vmatprep.subr.bf16.mxu1 %v1562_v62 }
  0x66   : > { %v1606_v36 = vpop.eup %1282 }
  0x67   : > { %v1608_v38 = vpop.eup %1284  ;;  %455 = vmatprep.mubr.f32.mxu0 %v1606_v36  ;;  %v534_v40 = vmul.f32 %v1606_v36, %v1606_v36  ;;  %v1682_v51 = vmul.f32 %v1606_v36, %v1489_v42 }
  0x68   : > { %976 = vmatpush1.bf16.msra.mxu0 %v1574_v15  ;;  %1040 = vmatpush1.bf16.msra.mxu1 %v1574_v15  ;;  %v533_v49 = vmul.f32 %v1608_v38, %v1608_v38 }
  0x69   : > { %978 = vmatprep.subr.bf16.mxu0 %v1579_v17  ;;  %1042 = vmatprep.subr.bf16.mxu1 %v1579_v17 }
  0x6c   : > { %980 = vmatpush1.bf16.msra.mxu0 %v1588_v29  ;;  %1044 = vmatpush1.bf16.msra.mxu1 %v1588_v29 }
  0x6d   : > { %1046 = vmatprep.subr.bf16.mxu0 %v1428_v3  ;;  %1110 = vmatprep.subr.bf16.mxu1 %v1428_v3 }
  0x6f   : > { %527 = vmatmul.mubr.f32.vlgmr.msra.gmra.mrb[0].mxu1 %v1597_v30  ;;  %456 = vmatmul.mubr.f32.vlgmr.msra.gmra.mrb[0].mxu0 %v1608_v38 }
  0x70   : > { %1112 = vmatpush1.bf16.msra.mxu1 %v1430_v7  ;;  %672 = vmatprep.mubr.f32.mxu1 %v607_v35 }
  0x71   : > { %1114 = vmatprep.subr.bf16.mxu1 %v1432_v8  ;;  %1048 = vmatpush1.bf16.msra.mxu0 %v1430_v7 }
  0x72   : > { %1050 = vmatprep.subr.bf16.mxu0 %v1432_v8  ;;  %599 = vmatprep.mubr.f32.mxu0 %v534_v40  ;;  %v286_v40 = vadd.f32 %v1608_v38, %v1606_v36 }
  0x74   : > { %1116 = vmatpush1.bf16.msra.mxu1 %v1438_v13  ;;  %287 = vadd.xlane.f32.xlu0 %v286_v40 }
  0x75   : > { %1118 = vmatprep.subr.bf16.mxu1 %v1442_v14  ;;  %1052 = vmatpush1.bf16.msra.mxu0 %v1438_v13 }
  0x76   : > { %1054 = vmatprep.subr.bf16.mxu0 %v1442_v14 }
  0x78   : > { %1120 = vmatpush1.bf16.msra.mxu1 %v1447_v19 }
  0x79   : > { %1122 = vmatprep.subr.bf16.mxu1 %v1451_v20  ;;  %1056 = vmatpush1.bf16.msra.mxu0 %v1447_v19 }
  0x7a   : > { %1058 = vmatprep.subr.bf16.mxu0 %v1451_v20 }
  0x7c   : > { %1124 = vmatpush1.bf16.msra.mxu1 %v1458_v25 }
  0x7d   : > { %1126 = vmatprep.subr.bf16.mxu1 %v1462_v26  ;;  %1060 = vmatpush1.bf16.msra.mxu0 %v1458_v25 }
  0x7e   : > { %1062 = vmatprep.subr.bf16.mxu0 %v1462_v26 }
  0x80   : > { %1128 = vmatpush1.bf16.msra.mxu1 %v1467_v31 }
  0x81   : > { %1130 = vmatprep.subr.bf16.mxu1 %v1471_v32  ;;  %1064 = vmatpush1.bf16.msra.mxu0 %v1467_v31 }
  0x82   : > { %1066 = vmatprep.subr.bf16.mxu0 %v1471_v32 }
  0x84   : > { %1132 = vmatpush1.bf16.msra.mxu1 %v1478_v37 }
  0x85   : > { %1134 = vmatprep.subr.bf16.mxu1 %v1482_v39  ;;  %1068 = vmatpush1.bf16.msra.mxu0 %v1478_v37 }
  0x86   : > { %1070 = vmatprep.subr.bf16.mxu0 %v1482_v39 }
  0x88   : > { %1136 = vmatpush1.bf16.msra.mxu1 %v1498_v48 }
  0x89   : > { %1138 = vmatprep.subr.bf16.mxu1 %v1502_v50  ;;  %1072 = vmatpush1.bf16.msra.mxu0 %v1498_v48 }
  0x8a   : > { %1074 = vmatprep.subr.bf16.mxu0 %v1502_v50 }
  0x8c   : > { %1140 = vmatpush1.bf16.msra.mxu1 %v1506_v58 }
  0x8d   : > { %1142 = vmatprep.subr.bf16.mxu1 %v1510_v59  ;;  %1076 = vmatpush1.bf16.msra.mxu0 %v1506_v58 }
  0x8e   : > { %1078 = vmatprep.subr.bf16.mxu0 %v1510_v59 }
  0x90   : > { %1144 = vmatpush1.bf16.msra.mxu1 %v1514_v0 }
  0x91   : > { %1146 = vmatprep.subr.bf16.mxu1 %v1518_v1  ;;  %1080 = vmatpush1.bf16.msra.mxu0 %v1514_v0 }
  0x92   : > { %1082 = vmatprep.subr.bf16.mxu0 %v1518_v1 }
  0x94   : > { %1148 = vmatpush1.bf16.msra.mxu1 %v1522_v9 }
  0x95   : > { %1150 = vmatprep.subr.bf16.mxu1 %v1526_v10  ;;  %1084 = vmatpush1.bf16.msra.mxu0 %v1522_v9 }
  0x96   : > { %1086 = vmatprep.subr.bf16.mxu0 %v1526_v10 }
  0x98   : > { %1152 = vmatpush1.bf16.msra.mxu1 %v1530_v22 }
  0x99   : > { %1154 = vmatprep.subr.bf16.mxu1 %v1534_v24  ;;  %1088 = vmatpush1.bf16.msra.mxu0 %v1530_v22 }
  0x9a   : > { %1090 = vmatprep.subr.bf16.mxu0 %v1534_v24 }
  0x9c   : > { %1156 = vmatpush1.bf16.msra.mxu1 %v1538_v33 }
  0x9d   : > { %1158 = vmatprep.subr.bf16.mxu1 %v1542_v34  ;;  %1092 = vmatpush1.bf16.msra.mxu0 %v1538_v33 }
  0x9e   : > { %1094 = vmatprep.subr.bf16.mxu0 %v1542_v34 }
  0xa0   : > { %1160 = vmatpush1.bf16.msra.mxu1 %v1548_v45 }
  0xa1   : > { %1162 = vmatprep.subr.bf16.mxu1 %v1552_v47  ;;  %1096 = vmatpush1.bf16.msra.mxu0 %v1548_v45 }
  0xa2   : > { %1098 = vmatprep.subr.bf16.mxu0 %v1552_v47 }
  0xa4   : > { %1164 = vmatpush1.bf16.msra.mxu1 %v1556_v60 }
  0xa5   : > { %1166 = vmatprep.subr.bf16.mxu1 %v1562_v62  ;;  %1100 = vmatpush1.bf16.msra.mxu0 %v1556_v60 }
  0xa6   : > { %1102 = vmatprep.subr.bf16.mxu0 %v1562_v62 }
  0xa8   : > { %1168 = vmatpush1.bf16.msra.mxu1 %v1574_v15 }
  0xa9   : > { %1170 = vmatprep.subr.bf16.mxu1 %v1579_v17  ;;  %1104 = vmatpush1.bf16.msra.mxu0 %v1574_v15 }
  0xaa   : > { %1106 = vmatprep.subr.bf16.mxu0 %v1579_v17 }
  0xac   : > { %1172 = vmatpush1.bf16.msra.mxu1 %v1588_v29 }
  0xad   : > { %1108 = vmatpush1.bf16.msra.mxu0 %v1588_v29 }
  0xae   : > { %1174 = vmatprep.subr.bf16.mxu0 %v1428_v3  ;;  %v281_v3 = vmul.f32 %v1608_v38, %v1597_v30 }
  0xaf   : > { %673 = vmatmul.mubr.f32.vlgmr.msra.gmra.mrb[2].mxu1 %v606_v44  ;;  %v320_v44 = vadd.f32 %v1608_v38, %v1597_v30 }
  0xb0   : > { %600 = vmatmul.mubr.f32.vlgmr.msra.gmra.mrb[2].mxu0 %v533_v49  ;;  %v283_v28 = vadd.f32 %v1682_v51, %v281_v3  ;;  %v321_v49 = vadd.f32 %v1606_v36, %v1489_v42 }
  0xb1   : > { %1176 = vmatpush1.bf16.msra.mxu0 %v1430_v7  ;;  %743 = vmatprep.mubr.f32.mxu0 %v1682_v51 }
  0xb2   : > { %1178 = vmatprep.subr.bf16.mxu0 %v1432_v8 }
  0xb5   : > { %1180 = vmatpush1.bf16.msra.mxu0 %v1438_v13  ;;  %v246_v13 = vmax.f32 %v1493_v46, 0.0 }
  0xb6   : > { %1182 = vmatprep.subr.bf16.mxu0 %v1442_v14  ;;  %v247_v14 = vmax.f32 %v1484_v41, 0.0 }
  0xb9   : > { %1184 = vmatpush1.bf16.msra.mxu0 %v1447_v19  ;;  %v258_v19 = vadd.f32 %v246_v13, %v1564_v4 }
  0xba   : > { %1186 = vmatprep.subr.bf16.mxu0 %v1451_v20  ;;  %v259_v20 = vadd.f32 %v247_v14, %v1558_v61 }
  0xbd   : > { %1188 = vmatpush1.bf16.msra.mxu0 %v1458_v25 }
  0xbe   : > { %1190 = vmatprep.subr.bf16.mxu0 %v1462_v26 }
  0xc1   : > { %1192 = vmatpush1.bf16.msra.mxu0 %v1467_v31  ;;  %v260_v31 = vsub.f32 0.0, %v258_v19 }
  0xc2   : > { %1194 = vmatprep.subr.bf16.mxu0 %v1471_v32  ;;  %v261_v32 = vsub.f32 0.0, %v259_v20 }
  0xc5   : > { %1196 = vmatpush1.bf16.msra.mxu0 %v1478_v37 }
  0xc6   : > { %1198 = vmatprep.subr.bf16.mxu0 %v1482_v39  ;;  %v256_v39 = vmax.f32 %v254_v23, -100.0  ;;  %v303_v23 = vsub.f32 %v246_v13, %v301_v12 }
  0xc9   : > { %1200 = vmatpush1.bf16.msra.mxu0 %v1498_v48  ;;  %v257_v48 = vmax.f32 %v255_v16, -100.0 }
  0xca   : > { %1202 = vmatprep.subr.bf16.mxu0 %v1502_v50  ;;  %v262_v50 = vmax.f32 %v260_v31, -100.0 }
  0xcd   : > { %1204 = vmatpush1.bf16.msra.mxu0 %v1506_v58  ;;  %v263_v58 = vmax.f32 %v261_v32, -100.0 }
  0xce   : > { %1206 = vmatprep.subr.bf16.mxu0 %v1510_v59 }
  0xd1   : > { %1208 = vmatpush1.bf16.msra.mxu0 %v1514_v0  ;;  %v270_v0 = vsub.f32 1.0, %v1597_v30 }
  0xd2   : > { %1210 = vmatprep.subr.bf16.mxu0 %v1518_v1  ;;  %v271_v1 = vsub.f32 1.0, %v1489_v42 }
  0xd3   : > { %v1719_v7 = vpop.xlane.xlu0 %290 }
  0xd4   : > { %v292_v8 = vmul.f32 0.0010405828, %v1719_v7 }
  0xd5   : > { %1212 = vmatpush1.bf16.msra.mxu0 %v1522_v9 }
  0xd6   : > { %1214 = vmatprep.subr.bf16.mxu0 %v1526_v10  ;;  %v293_v25 = vsub.f32 %v292_v8, %v1597_v30  ;;  %v294_v26 = vsub.f32 %v292_v8, %v1489_v42 }
  0xd8   : > { %v295_v9 = vand.u32 2147483647, %v293_v25  ;;  %v296_v10 = vand.u32 2147483647, %v294_v26 }
  0xd9   : > { %1216 = vmatpush1.bf16.msra.mxu0 %v1530_v22  ;;  %v268_v22 = vmul.f32 %v256_v39, %v1597_v30 }
  0xda   : > { %1218 = vmatprep.subr.bf16.mxu0 %v1534_v24  ;;  %v269_v24 = vmul.f32 %v257_v48, %v1489_v42 }
  0xdd   : > { %1220 = vmatpush1.bf16.msra.mxu0 %v1538_v33  ;;  %v272_v33 = vmul.f32 %v270_v0, %v262_v50 }
  0xde   : > { %1222 = vmatprep.subr.bf16.mxu0 %v1542_v34  ;;  %v273_v34 = vmul.f32 %v271_v1, %v263_v58 }
  0xdf   : > { %v274_v53 = vadd.f32 %v272_v33, %v268_v22 }
  0xe0   : > { %v275_v54 = vadd.f32 %v273_v34, %v269_v24 }
  0xe1   : > { %1224 = vmatpush1.bf16.msra.mxu0 %v1548_v45  ;;  %v276_v5 = vsub.f32 0.0, %v274_v53 }
  0xe2   : > { %1226 = vmatprep.subr.bf16.mxu0 %v1552_v47  ;;  %v277_v6 = vsub.f32 0.0, %v275_v54 }
  0xe5   : > { %1228 = vmatpush1.bf16.msra.mxu0 %v1556_v60  ;;  %v297_v60 = vmul.f32 5.0, %v295_v9 }
  0xe6   : > { %1230 = vmatprep.subr.bf16.mxu0 %v1562_v62  ;;  %v298_v62 = vmul.f32 5.0, %v296_v10 }
  0xe7   : > { %v299_v18 = vadd.f32 1.0, %v297_v60 }
  0xe8   : > { %v300_v21 = vadd.f32 1.0, %v298_v62 }
  0xe9   : > { %1232 = vmatpush1.bf16.msra.mxu0 %v1574_v15  ;;  %v302_v15 = vmul.f32 %v1489_v42, %v1484_v41  ;;  %v315_v8 = vmul.f32 %v299_v18, %v281_v3 }
  0xea   : > { %1234 = vmatprep.subr.bf16.mxu0 %v1579_v17  ;;  %v278_v17 = vadd.f32 %v277_v6, %v276_v5  ;;  %v316_v13 = vmul.f32 %v300_v21, %v1682_v51  ;;  %v789_v6 = vlaneseq }
  0xeb   : > { %v304_v27 = vsub.f32 %v247_v14, %v302_v15  ;;  %v322_v14 = vmul.f32 %v320_v44, %v299_v18 }
  0xec   : > { %279 = vadd.xlane.f32.xlu1 %v278_v17  ;;  %v317_v19 = vadd.f32 %v316_v13, %v315_v8 }
  0xed   : > { %1236 = vmatpush1.bf16.msra.mxu0 %v1588_v29  ;;  %v305_v29 = vadd.f32 %v303_v23, %v1564_v4  ;;  %v306_v35 = vadd.f32 %v304_v27, %v1558_v61  ;;  %v312_v4 = vadd.f32 %v300_v21, %v299_v18  ;;  %v323_v61 = vmul.f32 %v321_v49, %v300_v21 }
  0xef   : > { %v307_v46 = vmul.f32 %v305_v29, %v299_v18  ;;  %v308_v43 = vmul.f32 %v306_v35, %v300_v21  ;;  %v324_v20 = vadd.f32 %v323_v61, %v322_v14 }
  0xf0   : > { %744 = vmatmul.mubr.f32.vlgmr.msra.gmra.mrb[4].mxu0 %v281_v3  ;;  %284 = vadd.xlane.f32.xlu1 %v283_v28 }
  0xf1   : > { %v309_v41 = vadd.f32 %v308_v43, %v307_v46 }
  0xf4   : > { %310 = vadd.xlane.f32.xlu1 %v309_v41 }
  0xf8   : > { %318 = vadd.xlane.f32.xlu1 %v317_v19 }
 0x142   : > { %v528_v37 = vpop.f32.mrb[0].mxu1  ;;  %v457_v47 = vpop.f32.mrb[0].mxu0 }
 0x143   : > { %v530_v59 = vpop.f32.mrb[1].mxu1  ;;  %v752_v45 = vmul.f32 %v528_v37, %v528_v37  ;;  %v750_v55 = vmul.f32 %v457_v47, %v457_v47  ;;  %v754_v56 = vmul.f32 %v528_v37, %v457_v47  ;;  %v459_v57 = vpop.f32.mrb[1].mxu0 }
 0x144   : > { %v753_v52 = vmul.f32 %v530_v59, %v530_v59  ;;  %v751_v63 = vmul.f32 %v459_v57, %v459_v57  ;;  %v755_v2 = vmul.f32 %v530_v59, %v459_v57 }
 0x145   : > { %v772_v11 = vadd.f32 %v752_v45, %v750_v55  ;;  %v762_v1 = vmul.f32 2.0, %v754_v56 }
 0x146   : > { %v773_v16 = vadd.f32 %v753_v52, %v751_v63  ;;  %v763_v22 = vmul.f32 2.0, %v755_v2 }
 0x147   : > { %v774_v36 = vadd.f32 0.0001, %v772_v11  ;;  %v288_v11 = vpop.xlane.xlu0 %287 }
 0x148   : > { %v775_v51 = vadd.f32 0.0001, %v773_v16 }
 0x182   : > { %v674_v25 = vpop.f32.mrb[2].mxu1 }
 0x183   : > { %v758_v26 = vsub.f32 %v674_v25, %v752_v45  ;;  %v676_v31 = vpop.f32.mrb[3].mxu1  ;;  %v601_v37 = vpop.f32.mrb[2].mxu0  ;;  %v764_v45 = vadd.f32 0.0001, %v762_v1 }
 0x184   : > { %v759_v32 = vsub.f32 %v676_v31, %v753_v52  ;;  %v756_v39 = vsub.f32 %v601_v37, %v750_v55  ;;  %v603_v30 = vpop.f32.mrb[3].mxu0  ;;  %v765_v52 = vadd.f32 0.0001, %v763_v22 }
 0x185   : > { %v757_v38 = vsub.f32 %v603_v30, %v751_v63 }
 0x186   : > { %v776_v48 = vadd.f32 %v758_v26, %v756_v39 }
 0x187   : > { %v777_v42 = vadd.f32 %v759_v32, %v757_v38 }
 0x188   : > { %v778_v3 = vadd.f32 0.0009, %v776_v48 }
 0x189   : > { %v779_v50 = vadd.f32 0.0009, %v777_v42 }
 0x18a   : > { %v780_v58 = vmul.f32 %v778_v3, %v774_v36 }
 0x18b   : > { %v781_v59 = vmul.f32 %v779_v50, %v775_v51 }
 0x18c   : > { %1286 = vrcp.f32 %v780_v58 }
 0x18d   : > { %1288 = vrcp.f32 %v781_v59 }
 0x196   : > { %v1287_v55 = vpop.eup %1286 }
 0x197   : > { %v1289_v60 = vpop.eup %1288 }
 0x1c3   : > { %v745_v0 = vpop.f32.mrb[4].mxu0 }
 0x1c4   : > { %v760_v9 = vsub.f32 %v745_v0, %v754_v56  ;;  %v747_v10 = vpop.f32.mrb[5].mxu0  ;;  %v280_v56 = vpop.xlane.xlu1 %279 }
 0x1c5   : > { %v761_v24 = vsub.f32 %v747_v10, %v755_v2  ;;  %v790_v2 = vand.u32 127, %v789_v6 }
 0x1c6   : > { %v766_v33 = vmul.f32 2.0, %v760_v9 }
 0x1c7   : > { %v767_v34 = vmul.f32 2.0, %v761_v24  ;;  %vm791_vm0 = vcmp.eq.s32.totalorder %v790_v2, 0  ;;  %vm793_vm1 = vcmp.eq.s32.totalorder %v790_v2, 1  ;;  %vm795_vm2 = vcmp.eq.s32.totalorder %v790_v2, 2 }
 0x1c8   : > { %v768_v47 = vadd.f32 0.0009, %v766_v33  ;;  %v285_v12 = vpop.xlane.xlu1 %284  ;;  %vm797_vm3 = vcmp.eq.s32.totalorder %v790_v2, 3  ;;  %vm799_vm4 = vcmp.eq.s32.totalorder %v790_v2, 4  ;;  %vm801_vm5 = vcmp.eq.s32.totalorder %v790_v2, 5 }
 0x1c9   : > { %v769_v53 = vadd.f32 0.0009, %v767_v34  ;;  %vm803_vm6 = vcmp.eq.s32.totalorder %v790_v2, 6  ;;  %vm805_vm7 = vcmp.eq.s32.totalorder %v790_v2, 7  ;;  %vm807_vm8 = vcmp.eq.s32.totalorder %v790_v2, 8 }
 0x1ca   : > { %v770_v54 = vmul.f32 %v768_v47, %v764_v45 }
 0x1cb   : > { %v771_v57 = vmul.f32 %v769_v53, %v765_v52 }
 0x1cc   : > { %v784_v62 = vmul.f32 %v1287_v55, %v770_v54  ;;  %v311_v16 = vpop.xlane.xlu1 %310 }
 0x1cd   : > { %v785_v63 = vmul.f32 %v1289_v60, %v771_v57 }
 0x1cf   : > { %v786_v5 = vadd.f32 %v785_v63, %v784_v62 }
 0x1d0   : > { %v319_v35 = vpop.xlane.xlu1 %318 }
 0x1d1   : > { %787 = vadd.xlane.f32.xlu0 %v786_v5 }
 0x1d5   : > { %313 = vadd.xlane.f32.xlu0 %v312_v4 }
 0x1d9   : > { %325 = vadd.xlane.f32.xlu0 %v324_v20 }
 0x25e   : > { %v788_v15 = vpop.xlane.xlu0 %787 }
 0x25f   : > { %v792_v17 = vsel %vm791_vm0, %v788_v15, 0.0 }
 0x260   : > { %v794_v18 = vsel %vm793_vm1, %v280_v56, %v792_v17 }
 0x261   : > { %v796_v21 = vsel %vm795_vm2, %v285_v12, %v794_v18 }
 0x262   : > { %v798_v23 = vsel %vm797_vm3, %v288_v11, %v796_v21  ;;  %v314_v27 = vpop.xlane.xlu0 %313 }
 0x263   : > { %v800_v28 = vsel %vm799_vm4, %v1719_v7, %v798_v23 }
 0x264   : > { %v802_v29 = vsel %vm801_vm5, %v311_v16, %v800_v28 }
 0x265   : > { %v804_v40 = vsel %vm803_vm6, %v314_v27, %v802_v29 }
 0x266   : > { %v326_v46 = vpop.xlane.xlu0 %325  ;;  %v806_v43 = vsel %vm805_vm7, %v319_v35, %v804_v40 }
 0x267   : > { %v808_v41 = vsel %vm807_vm8, %v326_v46, %v806_v43 }
 0x268   : > { %810 = vst.msk [vmem:[%s226_s22] sm:$0xff] %vm809_vm9, %v808_v41 }
 0x269 PF: > { %s14_s14 = sadd.s32 1, %s1344_s14   ;;  %s1776_s12 = smov %s1340_s13 }
 0x26a   : > { %p11_p4 = scmp.ge.s32.totalorder %s14_s14, 4   ;;  %s1777_s13 = smov %s1779_s16 }
 0x26c   :  { %13 = sbr.rel (!%p11_p4) target bundleno = 2 (0x2), region = 70 }
 0x273   :  { %833 = vsyncpa [#allocation3], 1 }
 0x274   :  { %835 = vsyncpa [#allocation3 + $0x1], 1 }

</bundles_post_ra>
